<compile_context>
chip_gen: v5e
topology: v5e:2x2
jax: 0.10.0
libtpu: 0.0.40
codegen_flags: <defaults>
</compile_context>

<pallas_src>
import functools

import jax
import jax.numpy as jnp
from jax.experimental import pallas as pl
from jax.experimental.pallas import tpu as pltpu


_MIN_ROWS = 128  # batch-tile granularity (MXU-friendly, multiple of all sublane packings)


def _round_up(x, m):
    return ((x + m - 1) // m) * m


def _qnet_kernel(x_ref, w1_ref, b1_ref, w2_ref, b2_ref, w3_ref, b3_ref, o_ref):
    # Layer 1: single fused (tm, in_dim) @ (in_dim, H1) matmul (bf16 MXU, f32 accumulation).
    h = jnp.dot(x_ref[...], w1_ref[...], preferred_element_type=jnp.float32)
    h = jnp.maximum(h + b1_ref[...], 0.0)
    # Layer 2: (tm, H1) @ (H1, H2) -- the bulk of the FLOPs.
    h = jnp.dot(h.astype(w2_ref.dtype), w2_ref[...],
                preferred_element_type=jnp.float32)
    h = jnp.maximum(h + b2_ref[...], 0.0)
    # Head (H2 -> 1): VPU broadcast-multiply + lane reduction instead of an MXU pass.
    q = jnp.sum(h * w3_ref[...], axis=-1, keepdims=True) + b3_ref[...]
    o_ref[...] = q.astype(o_ref.dtype)   # (tm, 1): only 4 B/row of real writeback


def pack_params(w1, b1, w2, b2, w3, b3):
    """One-time conversion to kernel-ready layout (hoisted out of the per-call path)."""
    return {
        "w1": w1.astype(jnp.bfloat16),                 # (in_dim, H1)
        "b1": b1.reshape(1, -1).astype(jnp.float32),   # (1, H1)
        "w2": w2.astype(jnp.bfloat16),                 # (H1, H2)
        "b2": b2.reshape(1, -1).astype(jnp.float32),   # (1, H2)
        "w3": w3.reshape(1, -1).astype(jnp.float32),   # (1, H2) row for the f32 VPU head
        "b3": b3.reshape(1, 1).astype(jnp.float32),    # (1, 1)
    }


@functools.partial(jax.jit, static_argnames=("block_batch",))
def qnet_forward(params, s, a, *, block_batch=2048):
    """Q(s, a) = output_layer(relu(h2(relu(h1(cat(s, a))))))."""
    batch, state_dim = s.shape
    action_dim = a.shape[1]
    in_dim = state_dim + action_dim
    w1, b1 = params["w1"], params["b1"]
    w2, b2 = params["w2"], params["b2"]
    w3, b3 = params["w3"], params["b3"]
    h1 = w1.shape[1]
    h2 = w2.shape[1]

    # --- batch tiling --------------------------------------------------------
    # Tiles are multiples of 128 rows; cap at half the rounded batch when possible so both
    # v7x TensorCores get work under dimension_semantics=("parallel",). block_batch bounds
    # per-tile VMEM (~6 MiB at 2048 rows).
    padded = _round_up(batch, _MIN_ROWS)
    tm = min(_round_up(block_batch, _MIN_ROWS), padded)
    if padded >= 2 * _MIN_ROWS:
        tm = min(tm, _round_up(pl.cdiv(padded, 2), _MIN_ROWS))
    grid = (pl.cdiv(padded, tm),)

    # Fused concat + bf16 cast + pad: one XLA pass over the activations (~32 B/row).
    x = jnp.concatenate([s, a], axis=1).astype(jnp.bfloat16)
    x = jnp.pad(x, ((0, padded - batch), (0, 0)))

    tiled = lambda shape: pl.BlockSpec(shape, lambda i: (i, 0))      # batch-tiled
    resident = lambda shape: pl.BlockSpec(shape, lambda i: (0, 0))   # VMEM-resident weights

    weight_bytes = (w1.size + w2.size) * 2 + (b1.size + b2.size + w3.size + b3.size) * 4
    cost = pl.CostEstimate(
        flops=2 * padded * (in_dim * h1 + h1 * h2 + h2),
        transcendentals=0,
        bytes_accessed=padded * (in_dim * 2 + 4) + weight_bytes,
    )

    out = pl.pallas_call(
        _qnet_kernel,
        out_shape=jax.ShapeDtypeStruct((padded, 1), jnp.float32),
        grid=grid,
        in_specs=[
            tiled((tm, in_dim)),        # x = cat(s, a), bf16
            resident((in_dim, h1)),     # W1 (bf16)
            resident((1, h1)),          # b1 (f32)
            resident((h1, h2)),         # W2 (bf16)
            resident((1, h2)),          # b2 (f32)
            resident((1, h2)),          # w3 row (f32, VPU head)
            resident((1, 1)),           # b3 (f32)
        ],
        out_specs=tiled((tm, 1)),
        compiler_params=pltpu.CompilerParams(
            dimension_semantics=("parallel",),   # v7x: shard batch tiles across 2 TCs
            vmem_limit_bytes=48 * 1024 * 1024,   # headroom; still <= v7x's 64 MiB/TC
        ),
        cost_estimate=cost,
    )(x, w1, b1, w2, b2, w3, b3)

    # Strip the (at most 127-row) batch padding; true output is (batch, 1).
    return out[:batch]


def init_params(key, state_dim, action_dim, hidden_dims=(256, 256)):
    """Deterministic init mimicking PyTorch nn.Linear default (uniform +/- 1/sqrt(fan_in))."""
    dims = [state_dim + action_dim] + list(hidden_dims) + [1]
    params = []
    for i in range(len(dims) - 1):
        fan_in, fan_out = dims[i], dims[i + 1]
        key, kw, kb = jax.random.split(key, 3)
        bound = 1.0 / jnp.sqrt(jnp.float32(fan_in))
        w = jax.random.uniform(kw, (fan_in, fan_out), jnp.float32, -bound, bound)
        b = jax.random.uniform(kb, (fan_out,), jnp.float32, -bound, bound)
        params += [w, b]
    return params


if __name__ == "__main__":
    state_dim = 12
    action_dim = 4
    hidden_dims = (256, 256)
    batch = 2

    key = jax.random.PRNGKey(0)
    key, ks, ka = jax.random.split(key, 3)
    s = jax.random.normal(ks, (batch, state_dim), jnp.float32)
    a = jax.random.normal(ka, (batch, action_dim), jnp.float32)

    w1, b1, w2, b2, w3, b3 = init_params(key, state_dim, action_dim, hidden_dims)
    params = pack_params(w1, b1, w2, b2, w3, b3)   # one-time, outside the jitted forward

    q = qnet_forward(params, s, a)
    q = jax.block_until_ready(q)
    assert q.shape == (batch, 1)

    # Reference 1: same numerics as the kernel (bf16 MXU layers with f32 accumulation,
    # f32 VPU head) -- tight tolerance.
    bf = jnp.bfloat16
    x = jnp.concatenate([s, a], axis=1)
    h = jnp.maximum(
        jnp.dot(x.astype(bf), w1.astype(bf), preferred_element_type=jnp.float32) + b1, 0.0)
    h = jnp.maximum(
        jnp.dot(h.astype(bf), w2.astype(bf), preferred_element_type=jnp.float32) + b2, 0.0)
    ref_mixed = jnp.sum(h * w3.reshape(1, -1), axis=-1, keepdims=True) + b3
    assert jnp.allclose(q, ref_mixed, atol=1e-3, rtol=1e-3)

    # Reference 2: pure f32 PyTorch-equivalent forward (loose bound for bf16 rounding).
    h = jnp.maximum(x @ w1 + b1, 0.0)
    h = jnp.maximum(h @ w2 + b2, 0.0)
    ref_f32 = h @ w3 + b3
    assert jnp.allclose(q, ref_f32, atol=5e-2, rtol=5e-2)

    print("KERNEL_OK")
</pallas_src>

<mosaic_0001>
module attributes {stable_mosaic.version = 11 : i64} {
  func.func @_qnet_kernel(%arg0: i32, %arg1: memref<128x16xbf16, #tpu.memory_space<vmem>>, %arg2: memref<16x256xbf16, #tpu.memory_space<vmem>>, %arg3: memref<1x256xf32, #tpu.memory_space<vmem>>, %arg4: memref<256x256xbf16, #tpu.memory_space<vmem>>, %arg5: memref<1x256xf32, #tpu.memory_space<vmem>>, %arg6: memref<1x256xf32, #tpu.memory_space<vmem>>, %arg7: memref<1x1xf32, #tpu.memory_space<vmem>>, %arg8: memref<128x1xf32, #tpu.memory_space<vmem>>) attributes {dimension_semantics = [#tpu.dimension_semantics<parallel>], iteration_bounds = array<i64: 1>, scalar_prefetch = 0 : i64, scratch_operands = 0 : i64, tpu.core_type = #tpu.core_type<tc>, window_params = [{transform_indices = @transform_0, window_bounds = array<i64: 128, 16>}, {pipeline_mode = #tpu.pipeline_mode<synchronous>, transform_indices = @transform_1, window_bounds = array<i64: 16, 256>}, {pipeline_mode = #tpu.pipeline_mode<synchronous>, transform_indices = @transform_2, window_bounds = array<i64: 1, 256>}, {pipeline_mode = #tpu.pipeline_mode<synchronous>, transform_indices = @transform_3, window_bounds = array<i64: 256, 256>}, {pipeline_mode = #tpu.pipeline_mode<synchronous>, transform_indices = @transform_4, window_bounds = array<i64: 1, 256>}, {pipeline_mode = #tpu.pipeline_mode<synchronous>, transform_indices = @transform_5, window_bounds = array<i64: 1, 256>}, {pipeline_mode = #tpu.pipeline_mode<synchronous>, transform_indices = @transform_6, window_bounds = array<i64: 1, 1>}, {transform_indices = @transform_7, window_bounds = array<i64: 128, 1>}]} {
    %c0 = arith.constant 0 : index
    %c0_0 = arith.constant 0 : index
    %0 = vector.load %arg1[%c0, %c0_0] : memref<128x16xbf16, #tpu.memory_space<vmem>>, vector<128x16xbf16>
    %c0_1 = arith.constant 0 : index
    %c0_2 = arith.constant 0 : index
    %1 = vector.load %arg2[%c0_1, %c0_2] : memref<16x256xbf16, #tpu.memory_space<vmem>>, vector<16x256xbf16>
    %cst = arith.constant dense<0.000000e+00> : vector<128x256xf32>
    %2 = tpu.matmul %0, %1, %cst {dimension_numbers = #tpu.dot_dimension_numbers<[1], [0], [0], [1], [0, 0, 1, 1], [], []>} : vector<128x16xbf16>, vector<16x256xbf16>, vector<128x256xf32> -> vector<128x256xf32>
    %c0_3 = arith.constant 0 : index
    %c0_4 = arith.constant 0 : index
    %3 = vector.load %arg3[%c0_3, %c0_4] : memref<1x256xf32, #tpu.memory_space<vmem>>, vector<1x256xf32>
    %4 = vector.broadcast %3 : vector<1x256xf32> to vector<128x256xf32>
    %5 = arith.addf %2, %4 : vector<128x256xf32>
    %cst_5 = arith.constant 0.000000e+00 : f32
    %6 = vector.broadcast %cst_5 : f32 to vector<128x256xf32>
    %7 = arith.maximumf %5, %6 : vector<128x256xf32>
    %8 = arith.truncf %7 : vector<128x256xf32> to vector<128x256xbf16>
    %c0_6 = arith.constant 0 : index
    %c0_7 = arith.constant 0 : index
    %9 = vector.load %arg4[%c0_6, %c0_7] : memref<256x256xbf16, #tpu.memory_space<vmem>>, vector<256x256xbf16>
    %cst_8 = arith.constant dense<0.000000e+00> : vector<128x256xf32>
    %10 = tpu.matmul %8, %9, %cst_8 {dimension_numbers = #tpu.dot_dimension_numbers<[1], [0], [0], [1], [0, 0, 1, 1], [], []>} : vector<128x256xbf16>, vector<256x256xbf16>, vector<128x256xf32> -> vector<128x256xf32>
    %c0_9 = arith.constant 0 : index
    %c0_10 = arith.constant 0 : index
    %11 = vector.load %arg5[%c0_9, %c0_10] : memref<1x256xf32, #tpu.memory_space<vmem>>, vector<1x256xf32>
    %12 = vector.broadcast %11 : vector<1x256xf32> to vector<128x256xf32>
    %13 = arith.addf %10, %12 : vector<128x256xf32>
    %cst_11 = arith.constant 0.000000e+00 : f32
    %14 = vector.broadcast %cst_11 : f32 to vector<128x256xf32>
    %15 = arith.maximumf %13, %14 : vector<128x256xf32>
    %c0_12 = arith.constant 0 : index
    %c0_13 = arith.constant 0 : index
    %16 = vector.load %arg6[%c0_12, %c0_13] : memref<1x256xf32, #tpu.memory_space<vmem>>, vector<1x256xf32>
    %17 = vector.broadcast %16 : vector<1x256xf32> to vector<128x256xf32>
    %18 = arith.mulf %15, %17 : vector<128x256xf32>
    %cst_14 = arith.constant dense<0.000000e+00> : vector<128xf32>
    %19 = vector.multi_reduction <add>, %18, %cst_14 [1] : vector<128x256xf32> to vector<128xf32>
    %20 = vector.shape_cast %19 : vector<128xf32> to vector<128x1xf32>
    %c0_15 = arith.constant 0 : index
    %c0_16 = arith.constant 0 : index
    %21 = vector.load %arg7[%c0_15, %c0_16] : memref<1x1xf32, #tpu.memory_space<vmem>>, vector<1x1xf32>
    %22 = vector.broadcast %21 : vector<1x1xf32> to vector<128x1xf32>
    %23 = arith.addf %20, %22 : vector<128x1xf32>
    %c0_17 = arith.constant 0 : index
    %c0_18 = arith.constant 0 : index
    %24 = vector.load %arg8[%c0_17, %c0_18] : memref<128x1xf32, #tpu.memory_space<vmem>>, vector<128x1xf32>
    tpu.vector_store %arg8[%c0_17, %c0_18], %23 {strides = array<i32>} : memref<128x1xf32, #tpu.memory_space<vmem>>, vector<128x1xf32>,
    return
  }
  func.func @transform_0(%arg0: i32) -> (i32, i32) {
    %c0_i32 = arith.constant 0 : i32
    %c0_i32_0 = arith.constant 0 : i32
    return %arg0, %c0_i32 : i32, i32
  }
  func.func @transform_1(%arg0: i32) -> (i32, i32) {
    %c0_i32 = arith.constant 0 : i32
    %c0_i32_0 = arith.constant 0 : i32
    %c0_i32_1 = arith.constant 0 : i32
    return %c0_i32, %c0_i32_0 : i32, i32
  }
  func.func @transform_2(%arg0: i32) -> (i32, i32) {
    %c0_i32 = arith.constant 0 : i32
    %c0_i32_0 = arith.constant 0 : i32
    %c0_i32_1 = arith.constant 0 : i32
    return %c0_i32, %c0_i32_0 : i32, i32
  }
  func.func @transform_3(%arg0: i32) -> (i32, i32) {
    %c0_i32 = arith.constant 0 : i32
    %c0_i32_0 = arith.constant 0 : i32
    %c0_i32_1 = arith.constant 0 : i32
    return %c0_i32, %c0_i32_0 : i32, i32
  }
  func.func @transform_4(%arg0: i32) -> (i32, i32) {
    %c0_i32 = arith.constant 0 : i32
    %c0_i32_0 = arith.constant 0 : i32
    %c0_i32_1 = arith.constant 0 : i32
    return %c0_i32, %c0_i32_0 : i32, i32
  }
  func.func @transform_5(%arg0: i32) -> (i32, i32) {
    %c0_i32 = arith.constant 0 : i32
    %c0_i32_0 = arith.constant 0 : i32
    %c0_i32_1 = arith.constant 0 : i32
    return %c0_i32, %c0_i32_0 : i32, i32
  }
  func.func @transform_6(%arg0: i32) -> (i32, i32) {
    %c0_i32 = arith.constant 0 : i32
    %c0_i32_0 = arith.constant 0 : i32
    %c0_i32_1 = arith.constant 0 : i32
    return %c0_i32, %c0_i32_0 : i32, i32
  }
  func.func @transform_7(%arg0: i32) -> (i32, i32) {
    %c0_i32 = arith.constant 0 : i32
    %c0_i32_0 = arith.constant 0 : i32
    return %arg0, %c0_i32 : i32, i32
  }
}

</mosaic_0001>

<bundles_post_ra>
// kernel: qnet_forward.1
= control target key start
LH: loop header
LB: loop body
LE: loop exit
PB: predicated region body
PF: predicated region fallthrough
CT: control target
= control target key end

     0   :  { %s1430_s0 = inlined_call_operand.vmem [shape: bf16[128,16], index: 0, kind: input, shape index: {}]   ;;  %s1431_s1 = inlined_call_operand.vmem [shape: bf16[16,256], index: 1, kind: input, shape index: {}]   ;;  %s1432_s2 = inlined_call_operand.vmem [shape: f32[1,256], index: 2, kind: input, shape index: {}]   ;;  %s1433_s3 = inlined_call_operand.hbm [shape: bf16[256,256], index: 3, kind: input, shape index: {}]   ;;  %s1434_s4 = inlined_call_operand.vmem [shape: f32[1,256], index: 4, kind: input, shape index: {}]   ;;  %s1435_s5 = inlined_call_operand.vmem [shape: f32[1,256], index: 5, kind: input, shape index: {}]   ;;  %s1436_s6 = inlined_call_operand.<no memory space> [shape: f32[1,1], index: 6, kind: input, shape index: {}]   ;;  %s1437_s7 = inlined_call_operand.vmem [shape: f32[128,1], index: 7, kind: output, shape index: {}]  }
   0x1   :  { %v12_v0 = vstv %s1436_s6 }
   0x2   :  { %13 = vst [vmem:[#allocation2] sm:$0x1] %v12_v0 }
   0x3   :  { %14 = vsyncpa [#allocation4], 0  ;;  %s25_s28 = sshll.u32 %s1433_s3, 4  ;;  %s1110_s29 = smov [#allocation3]   ;;  %s26_s28 = int_to_ptr.hbm [resolvable:$true] %s25_s28 }
   0x4   :  { %s27_s30 = sshll.u32 %s1110_s29, 4  ;;  %s1111_s8 = smov 128   ;;  %s28_s30 = int_to_ptr.vmem [resolvable:$true] %s27_s30 }
   0x5   :  { %s1112_s9 = smov 8  }
   0x6   :  { %33 = dma.hbm_to_vmem [thread:$0]  %s26_s28, 4096, %s28_s30, [#allocation4], %s1111_s8, %s1111_s8, %s1112_s9  }
   0x7   :  { %1108 = dma.done.wait [#allocation4], 4096  }
   0x8   :  { %1109 = vsyncadd [#allocation4], 4294963200  ;;  %v878_v1 = vld [vmem:[%s1431_s1] sm:$0xf]  ;;  %v1037_v2 = vld [vmem:[%s1431_s1 + $0x4] sm:$0xf0] }
   0x9   :  { %v1036_v3 = vld [vmem:[%s1431_s1 + $0x4] sm:$0xf]  ;;  %v879_v4 = vor.u32 %v1037_v2, %v878_v1  ;;  %v880_v5 = vld [vmem:[%s1431_s1 + $0x8] sm:$0xf0]  ;;  %vm119_vm0 = vcmask 130048   ;;  %v1030_v10 = vld [vmem:[%s1430_s0 + $0x10] sm:$0xff] }
   0xa   :  { %v883_v6 = vor.u32 %v1036_v3, %v880_v5  ;;  %v1028_v7 = vld [vmem:[%s1430_s0] sm:$0xff]  ;;  %v1029_v8 = vld [vmem:[%s1430_s0 + $0x8] sm:$0xff]  ;;  %v958_v12 = vld [vmem:[#allocation3 + $0x70] sm:$0xf]  ;;  %vm822_vm1 = vcmask 7168  }
   0xb   :  { %151 = vmatpush.bf16.msra.mxu0 %v879_v4  ;;  %1070 = vmatpush.bf16.msra.mxu2 %v879_v4  ;;  %v1184_v9 = vld [vmem:[%s1430_s0 + $0x20] sm:$0xff]  ;;  %v1033_v11 = vld [vmem:[%s1430_s0 + $0x28] sm:$0xff]  ;;  %v1053_v13 = vld [vmem:[#allocation3 + $0x74] sm:$0xf0] }
   0xc   :  { %200 = vmatpush.bf16.msra.mxu1 %v883_v6  ;;  %1071 = vmatpush.bf16.msra.mxu3 %v883_v6  ;;  %v1022_v14 = vld [vmem:[#allocation3 + $0xf0] sm:$0xf]  ;;  %v1069_v15 = vld [vmem:[#allocation3 + $0xf4] sm:$0xf0]  ;;  %v959_v16 = vor.u32 %v1053_v13, %v958_v12  ;;  %v950_v18 = vld [vmem:[#allocation3 + $0x60] sm:$0xf] }
   0xd   :  { %v1023_v17 = vor.u32 %v1069_v15, %v1022_v14  ;;  %v1051_v19 = vld [vmem:[#allocation3 + $0x64] sm:$0xf0]  ;;  %v1052_v20 = vld [vmem:[#allocation3 + $0x74] sm:$0xf]  ;;  %v960_v21 = vld [vmem:[#allocation3 + $0x78] sm:$0xf0] }
   0xe   :  { %884 = vmatmul.msk.bf16.vlgmr.msra.gmra.mxu0 %vm119_vm0, %v1028_v7  ;;  %889 = vmatmul.msk.bf16.vlgmr.msra.gmra.mxu2 %vm119_vm0, %v1033_v11  ;;  %v1068_v22 = vld [vmem:[#allocation3 + $0xf4] sm:$0xf]  ;;  %v951_v23 = vor.u32 %v1051_v19, %v950_v18  ;;  %v1198_v24 = vor.u32 %v1052_v20, %v960_v21  ;;  %v1024_v25 = vld [vmem:[#allocation3 + $0xf8] sm:$0xf0]  ;;  %v1014_v26 = vld [vmem:[#allocation3 + $0xe0] sm:$0xf] }
   0xf   :  { %892 = vmatmul.msk.bf16.vlgmr.msra.gmra.mxu1 %vm119_vm0, %v1028_v7  ;;  %896 = vmatmul.msk.bf16.vlgmr.msra.gmra.mxu3 %vm119_vm0, %v1184_v9  ;;  %v1067_v27 = vld [vmem:[#allocation3 + $0xe4] sm:$0xf0]  ;;  %v1027_v28 = vor.u32 %v1068_v22, %v1024_v25  ;;  %v942_v30 = vld [vmem:[#allocation3 + $0x50] sm:$0xf]  ;;  %v1049_v31 = vld [vmem:[#allocation3 + $0x54] sm:$0xf0] }
  0x10   :  { %488 = vmatpush.bf16.msrb.mxu2 %v959_v16  ;;  %537 = vmatpush.bf16.msrb.mxu3 %v1023_v17  ;;  %v1015_v29 = vor.u32 %v1067_v27, %v1014_v26  ;;  %v1050_v32 = vld [vmem:[#allocation3 + $0x64] sm:$0xf]  ;;  %v952_v33 = vld [vmem:[#allocation3 + $0x68] sm:$0xf0]  ;;  %v1006_v38 = vld [vmem:[#allocation3 + $0xd0] sm:$0xf]  ;;  %v943_v39 = vor.u32 %v1049_v31, %v942_v30 }
  0x11   :  { %586 = vmatpush.bf16.msrb.mxu0 %v1198_v24  ;;  %v1066_v34 = vld [vmem:[#allocation3 + $0xe4] sm:$0xf]  ;;  %v1016_v35 = vld [vmem:[#allocation3 + $0xe8] sm:$0xf0]  ;;  %635 = vmatpush.bf16.msrb.mxu1 %v1027_v28  ;;  %v1201_v36 = vor.u32 %v1050_v32, %v952_v33  ;;  %v934_v40 = vld [vmem:[#allocation3 + $0x40] sm:$0xf] }
  0x12   :  { %v1019_v37 = vor.u32 %v1066_v34, %v1016_v35  ;;  %v1047_v41 = vld [vmem:[#allocation3 + $0x44] sm:$0xf0]  ;;  %v1065_v42 = vld [vmem:[#allocation3 + $0xd4] sm:$0xf0]  ;;  %v1064_v44 = vld [vmem:[#allocation3 + $0xd4] sm:$0xf] }
  0x13   :  { %v1007_v43 = vor.u32 %v1065_v42, %v1006_v38  ;;  %v1008_v45 = vld [vmem:[#allocation3 + $0xd8] sm:$0xf0]  ;;  %v1048_v46 = vld [vmem:[#allocation3 + $0x54] sm:$0xf]  ;;  %v998_v48 = vld [vmem:[#allocation3 + $0xc0] sm:$0xf]  ;;  %v935_v55 = vor.u32 %v1047_v41, %v934_v40 }
  0x14   :  { %489 = vmatpush.bf16.msrb.mxu2 %v951_v23  ;;  %538 = vmatpush.bf16.msrb.mxu3 %v1015_v29  ;;  %v944_v47 = vld [vmem:[#allocation3 + $0x58] sm:$0xf0]  ;;  %v1063_v49 = vld [vmem:[#allocation3 + $0xc4] sm:$0xf0]  ;;  %v1011_v50 = vor.u32 %v1064_v44, %v1008_v45  ;;  %v1046_v52 = vld [vmem:[#allocation3 + $0x44] sm:$0xf] }
  0x15   :  { %587 = vmatpush.bf16.msrb.mxu0 %v1201_v36  ;;  %636 = vmatpush.bf16.msrb.mxu1 %v1019_v37  ;;  %v1204_v51 = vor.u32 %v1048_v46, %v944_v47  ;;  %v936_v53 = vld [vmem:[#allocation3 + $0x48] sm:$0xf0]  ;;  %v1031_v54 = vld [vmem:[%s1430_s0 + $0x18] sm:$0xff]  ;;  %v1062_v56 = vld [vmem:[#allocation3 + $0xc4] sm:$0xf]  ;;  %v999_v60 = vor.u32 %v1063_v49, %v998_v48 }
  0x16   :  { %v1000_v57 = vld [vmem:[#allocation3 + $0xc8] sm:$0xf0]  ;;  %v926_v58 = vld [vmem:[#allocation3 + $0x30] sm:$0xf]  ;;  %v1045_v59 = vld [vmem:[#allocation3 + $0x34] sm:$0xf0]  ;;  %v1213_v62 = vor.u32 %v1046_v52, %v936_v53 }
  0x17   :  { %v1034_v61 = vld [vmem:[%s1430_s0 + $0x30] sm:$0xff]  ;;  %v1003_v63 = vor.u32 %v1062_v56, %v1000_v57  ;;  %v927_v0 = vor.u32 %v1045_v59, %v926_v58  ;;  %v918_v1 = vld [vmem:[#allocation3 + $0x20] sm:$0xf]  ;;  %v1043_v2 = vld [vmem:[#allocation3 + $0x24] sm:$0xf0] }
  0x18   :  { %490 = vmatpush.bf16.msrb.mxu2 %v943_v39  ;;  %539 = vmatpush.bf16.msrb.mxu3 %v1007_v43  ;;  %v919_v3 = vor.u32 %v1043_v2, %v918_v1  ;;  %v1035_v4 = vld [vmem:[%s1430_s0 + $0x38] sm:$0xff]  ;;  %v1042_v15 = vld [vmem:[#allocation3 + $0x24] sm:$0xf]  ;;  %v920_v16 = vld [vmem:[#allocation3 + $0x28] sm:$0xf0] }
  0x19   :  { %588 = vmatpush.bf16.msrb.mxu0 %v1204_v51  ;;  %637 = vmatpush.bf16.msrb.mxu1 %v1011_v50  ;;  %v1044_v5 = vld [vmem:[#allocation3 + $0x34] sm:$0xf]  ;;  %v928_v6 = vld [vmem:[#allocation3 + $0x38] sm:$0xf0]  ;;  %v923_v17 = vor.u32 %v1042_v15, %v920_v16  ;;  %v1059_v18 = vld [vmem:[#allocation3 + $0xa4] sm:$0xf0] }
  0x1a   :  { %v931_v7 = vor.u32 %v1044_v5, %v928_v6  ;;  %v992_v13 = vld [vmem:[#allocation3 + $0xb8] sm:$0xf0]  ;;  %v910_v19 = vld [vmem:[#allocation3 + $0x10] sm:$0xf]  ;;  %v1041_v20 = vld [vmem:[#allocation3 + $0x14] sm:$0xf0] }
  0x1b   :  { %v1058_v22 = vld [vmem:[#allocation3 + $0xa4] sm:$0xf]  ;;  %v911_v23 = vor.u32 %v1041_v20, %v910_v19  ;;  %v984_v25 = vld [vmem:[#allocation3 + $0xa8] sm:$0xf0]  ;;  %v1040_v26 = vld [vmem:[#allocation3 + $0x14] sm:$0xf] }
  0x1c   :  { %491 = vmatpush.bf16.msrb.mxu2 %v935_v55  ;;  %540 = vmatpush.bf16.msrb.mxu3 %v999_v60  ;;  %v912_v27 = vld [vmem:[#allocation3 + $0x18] sm:$0xf0]  ;;  %v987_v28 = vor.u32 %v1058_v22, %v984_v25  ;;  %v974_v30 = vld [vmem:[#allocation3 + $0x90] sm:$0xf]  ;;  %v1057_v31 = vld [vmem:[#allocation3 + $0x94] sm:$0xf0] }
  0x1d   :  { %589 = vmatpush.bf16.msrb.mxu0 %v1213_v62  ;;  %638 = vmatpush.bf16.msrb.mxu1 %v1003_v63  ;;  %v915_v29 = vor.u32 %v1040_v26, %v912_v27  ;;  %v1056_v32 = vld [vmem:[#allocation3 + $0x94] sm:$0xf]  ;;  %v975_v33 = vor.u32 %v1057_v31, %v974_v30  ;;  %v976_v34 = vld [vmem:[#allocation3 + $0x98] sm:$0xf0]  ;;  %v902_v35 = vld [vmem:[#allocation3] sm:$0xf] }
  0x1e   :  { %885 = vmatmul.msk.bf16.gmra.mxu0 %vm119_vm0, %v1029_v8  ;;  %890 = vmatmul.msk.bf16.gmra.mxu2 %vm119_vm0, %v1034_v61  ;;  %v1039_v37 = vld [vmem:[#allocation3 + $0x4] sm:$0xf0]  ;;  %v979_v38 = vor.u32 %v1056_v32, %v976_v34  ;;  %v1038_v39 = vld [vmem:[#allocation3 + $0x4] sm:$0xf]  ;;  %v904_v41 = vld [vmem:[#allocation3 + $0x8] sm:$0xf0] }
  0x1f   :  { %893 = vmatmul.msk.bf16.gmra.mxu1 %vm119_vm0, %v1029_v8  ;;  %897 = vmatmul.msk.bf16.gmra.mxu3 %vm119_vm0, %v1033_v11  ;;  %v990_v8 = vld [vmem:[#allocation3 + $0xb0] sm:$0xf]  ;;  %v1060_v11 = vld [vmem:[#allocation3 + $0xb4] sm:$0xf]  ;;  %v903_v40 = vor.u32 %v1039_v37, %v902_v35  ;;  %v907_v42 = vor.u32 %v1038_v39, %v904_v41  ;;  %v966_v43 = vld [vmem:[#allocation3 + $0x80] sm:$0xf] }
  0x20   :  { %492 = vmatpush.bf16.msrb.mxu2 %v927_v0  ;;  %v995_v14 = vor.u32 %v1060_v11, %v992_v13  ;;  %v1055_v44 = vld [vmem:[#allocation3 + $0x84] sm:$0xf0]  ;;  %v1054_v45 = vld [vmem:[#allocation3 + $0x84] sm:$0xf]  ;;  %v968_v47 = vld [vmem:[#allocation3 + $0x88] sm:$0xf0] }
  0x21   :  { %590 = vmatpush.bf16.msrb.mxu0 %v931_v7  ;;  %v967_v46 = vor.u32 %v1055_v44, %v966_v43  ;;  %v971_v48 = vor.u32 %v1054_v45, %v968_v47  ;;  %v63_v49 = vld [vmem:[%s1432_s2] sm:$0x3] }
  0x22   :  { %639 = vmatpush.bf16.msrb.mxu1 %v995_v14  ;;  %v1234_v53 = vperm.slane %v63_v49, 1 }
  0x24   :  { %493 = vmatpush.bf16.msrb.mxu2 %v919_v3 }
  0x25   :  { %591 = vmatpush.bf16.msrb.mxu0 %v923_v17 }
  0x26   :  { %640 = vmatpush.bf16.msrb.mxu1 %v987_v28 }
  0x28   :  { %494 = vmatpush.bf16.msrb.mxu2 %v911_v23 }
  0x29   :  { %592 = vmatpush.bf16.msrb.mxu0 %v915_v29 }
  0x2a   :  { %641 = vmatpush.bf16.msrb.mxu1 %v979_v38 }
  0x2c   :  { %495 = vmatpush.bf16.msrb.mxu2 %v903_v40 }
  0x2d   :  { %593 = vmatpush.bf16.msrb.mxu0 %v907_v42 }
  0x2e   :  { %886 = vmatmul.msk.bf16.gmra.mxu0 %vm119_vm0, %v1030_v10  ;;  %891 = vmatmul.msk.bf16.gmra.mxu2 %vm119_vm0, %v1035_v4 }
  0x2f   :  { %894 = vmatmul.msk.bf16.gmra.mxu1 %vm119_vm0, %v1030_v10  ;;  %898 = vmatmul.msk.bf16.gmra.mxu3 %vm119_vm0, %v1034_v61  ;;  %v1061_v10 = vld [vmem:[#allocation3 + $0xb4] sm:$0xf0] }
  0x30   :  { %v991_v12 = vor.u32 %v1061_v10, %v990_v8  ;;  %1072 = vmatpush.bf16.msra.mxu2 %v1198_v24  ;;  %642 = vmatpush.bf16.msrb.mxu1 %v971_v48 }
  0x32   :  { %541 = vmatpush.bf16.msrb.mxu3 %v991_v12 }
  0x34   :  { %1073 = vmatpush.bf16.msra.mxu2 %v1201_v36 }
  0x38   :  { %1074 = vmatpush.bf16.msra.mxu2 %v1204_v51 }
  0x3c   :  { %1075 = vmatpush.bf16.msra.mxu2 %v1213_v62 }
  0x3e   :  { %887 = vmatmul.msk.bf16.gmra.mxu0 %vm119_vm0, %v1031_v54 }
  0x3f   :  { %895 = vmatmul.msk.bf16.gmra.mxu1 %vm119_vm0, %v1031_v54  ;;  %899 = vmatmul.msk.bf16.gmra.mxu3 %vm119_vm0, %v1035_v4  ;;  %v1236_v54 = vperm.slane %v63_v49, 0 }
  0x40   :  { %1076 = vmatpush.bf16.msra.mxu2 %v931_v7 }
  0x44   :  { %1077 = vmatpush.bf16.msra.mxu2 %v923_v17 }
  0x48   :  { %1078 = vmatpush.bf16.msra.mxu2 %v915_v29 }
  0x4c   :  { %1079 = vmatpush.bf16.msra.mxu2 %v907_v42 }
  0x4e   :  { %888 = vmatmul.msk.bf16.gmra.mxu0 %vm119_vm0, %v1184_v9  ;;  %v982_v9 = vld [vmem:[#allocation3 + $0xa0] sm:$0xf] }
  0x4f   :  { %v983_v21 = vor.u32 %v1059_v18, %v982_v9 }
  0x51   :  { %542 = vmatpush.bf16.msrb.mxu3 %v983_v21 }
  0x55   :  { %543 = vmatpush.bf16.msrb.mxu3 %v975_v33 }
  0x59   :  { %544 = vmatpush.bf16.msrb.mxu3 %v967_v46 }
  0x8b   :  { %v153_v50 = vpop.f32.mrf.mxu0 }
  0x8c   :  { %v202_v52 = vpop.f32.mrf.mxu1  ;;  %v154_v36 = vadd.f32 %v153_v50, %v1236_v54 }
  0x8d   :  { %v203_v24 = vadd.f32 %v202_v52, %v1234_v53 }
  0x8e   :  { %v242_v59 = vmax.f32 %v154_v36, 0.0 }
  0x8f   :  { %v243_v57 = vmax.f32 %v203_v24, 0.0 }
  0x91   :  { %v178_v48 = vpop.f32.mrf.mxu2 }
  0x92   :  { %v222_v26 = vpop.f32.mrf.mxu3 }
  0x93   :  { %v155_v51 = vpop.f32.mrf.mxu0  ;;  %v223_v49 = vadd.f32 %v222_v26, %v1234_v53 }
  0x94   :  { %v156_v55 = vadd.f32 %v155_v51, %v1236_v54  ;;  %v204_v56 = vpop.f32.mrf.mxu1 }
  0x95   :  { %v205_v58 = vadd.f32 %v204_v56, %v1234_v53  ;;  %v259_v24 = vmax.f32 %v223_v49, 0.0 }
  0x96   :  { %v244_v60 = vmax.f32 %v156_v55, 0.0 }
  0x97   :  { %v245_v61 = vmax.f32 %v205_v58, 0.0 }
  0x98   :  { %v274_v62 = vpack.c.bf16 %v244_v60, %v242_v59 }
  0x99   :  { %v275_v63 = vpack.c.bf16 %v245_v61, %v243_v57  ;;  %v180_v57 = vpop.f32.mrf.mxu2 }
  0x9a   :  { %496 = vmatmul.bf16.vlgmr.msrb.gmra.mxu2 %v274_v62  ;;  %594 = vmatmul.bf16.vlgmr.msrb.gmra.mxu0 %v274_v62  ;;  %v224_v32 = vpop.f32.mrf.mxu3 }
  0x9b   :  { %v158_v0 = vpop.f32.mrf.mxu0  ;;  %545 = vmatmul.bf16.vlgmr.msrb.gmra.mxu3 %v275_v63  ;;  %643 = vmatmul.bf16.vlgmr.msrb.gmra.mxu1 %v275_v63  ;;  %v225_v50 = vadd.f32 %v224_v32, %v1234_v53 }
  0x9c   :  { %v207_v1 = vpop.f32.mrf.mxu1  ;;  %v159_v3 = vadd.f32 %v158_v0, %v1236_v54 }
  0x9d   :  { %v208_v2 = vadd.f32 %v207_v1, %v1234_v53  ;;  %v261_v51 = vmax.f32 %v225_v50, 0.0 }
  0x9e   :  { %v246_v10 = vmax.f32 %v159_v3, 0.0  ;;  %v181_v3 = vadd.f32 %v180_v57, %v1236_v54 }
  0x9f   :  { %v247_v7 = vmax.f32 %v208_v2, 0.0  ;;  %v283_v60 = vpack.c.bf16 %v261_v51, %v259_v24  ;;  %v179_v2 = vadd.f32 %v178_v48, %v1236_v54 }
  0xa1   :  { %v183_v0 = vpop.f32.mrf.mxu2 }
  0xa2   :  { %v227_v46 = vpop.f32.mrf.mxu3 }
  0xa3   :  { %v160_v4 = vpop.f32.mrf.mxu0  ;;  %v228_v63 = vadd.f32 %v227_v46, %v1234_v53 }
  0xa4   :  { %v161_v5 = vadd.f32 %v160_v4, %v1236_v54  ;;  %v209_v6 = vpop.f32.mrf.mxu1 }
  0xa5   :  { %v210_v8 = vadd.f32 %v209_v6, %v1234_v53  ;;  %v263_v4 = vmax.f32 %v228_v63, 0.0  ;;  %v262_v6 = vmax.f32 %v179_v2, 0.0 }
  0xa6   :  { %v248_v11 = vmax.f32 %v161_v5, 0.0 }
  0xa7   :  { %v249_v12 = vmax.f32 %v210_v8, 0.0 }
  0xa8   :  { %v276_v13 = vpack.c.bf16 %v248_v11, %v246_v10 }
  0xa9   :  { %v277_v14 = vpack.c.bf16 %v249_v12, %v247_v7  ;;  %v264_v7 = vmax.f32 %v181_v3, 0.0  ;;  %v185_v12 = vpop.f32.mrf.mxu2 }
  0xaa   :  { %501 = vmatmul.bf16.gmra.mxu2 %v276_v13  ;;  %599 = vmatmul.bf16.gmra.mxu0 %v276_v13  ;;  %v229_v56 = vpop.f32.mrf.mxu3 }
  0xab   :  { %v163_v15 = vpop.f32.mrf.mxu0  ;;  %550 = vmatmul.bf16.gmra.mxu3 %v277_v14  ;;  %648 = vmatmul.bf16.gmra.mxu1 %v277_v14  ;;  %v230_v1 = vadd.f32 %v229_v56, %v1234_v53  ;;  %v284_v10 = vpack.c.bf16 %v264_v7, %v262_v6 }
  0xac   :  { %v212_v16 = vpop.f32.mrf.mxu1  ;;  %v164_v9 = vadd.f32 %v163_v15, %v1236_v54  ;;  %v184_v15 = vadd.f32 %v183_v0, %v1236_v54 }
  0xad   :  { %v213_v17 = vadd.f32 %v212_v16, %v1234_v53  ;;  %v265_v5 = vmax.f32 %v230_v1, 0.0  ;;  %v186_v16 = vadd.f32 %v185_v12, %v1236_v54 }
  0xae   :  { %v250_v23 = vmax.f32 %v164_v9, 0.0 }
  0xaf   :  { %v251_v21 = vmax.f32 %v213_v17, 0.0  ;;  %v285_v8 = vpack.c.bf16 %v265_v5, %v263_v4 }
  0xb2   :  { %v232_v62 = vpop.f32.mrf.mxu3 }
  0xb3   :  { %v165_v18 = vpop.f32.mrf.mxu0  ;;  %v233_v13 = vadd.f32 %v232_v62, %v1234_v53 }
  0xb4   :  { %v166_v19 = vadd.f32 %v165_v18, %v1236_v54  ;;  %v214_v20 = vpop.f32.mrf.mxu1  ;;  %v188_v18 = vpop.f32.mrf.mxu2 }
  0xb5   :  { %v215_v22 = vadd.f32 %v214_v20, %v1234_v53  ;;  %v267_v9 = vmax.f32 %v233_v13, 0.0  ;;  %v266_v20 = vmax.f32 %v184_v15, 0.0 }
  0xb6   :  { %v252_v25 = vmax.f32 %v166_v19, 0.0 }
  0xb7   :  { %v253_v27 = vmax.f32 %v215_v22, 0.0 }
  0xb8   :  { %v278_v28 = vpack.c.bf16 %v252_v25, %v250_v23 }
  0xb9   :  { %v279_v29 = vpack.c.bf16 %v253_v27, %v251_v21  ;;  %v268_v21 = vmax.f32 %v186_v16, 0.0 }
  0xba   :  { %506 = vmatmul.bf16.gmra.mxu2 %v278_v28  ;;  %604 = vmatmul.bf16.gmra.mxu0 %v278_v28  ;;  %v234_v11 = vpop.f32.mrf.mxu3 }
  0xbb   :  { %v168_v30 = vpop.f32.mrf.mxu0  ;;  %555 = vmatmul.bf16.gmra.mxu3 %v279_v29  ;;  %653 = vmatmul.bf16.gmra.mxu1 %v279_v29  ;;  %v235_v14 = vadd.f32 %v234_v11, %v1234_v53  ;;  %v286_v23 = vpack.c.bf16 %v268_v21, %v266_v20  ;;  %v189_v29 = vadd.f32 %v188_v18, %v1236_v54 }
  0xbc   :  { %v217_v31 = vpop.f32.mrf.mxu1  ;;  %v169_v34 = vadd.f32 %v168_v30, %v1236_v54  ;;  %v190_v26 = vpop.f32.mrf.mxu2 }
  0xbd   :  { %v218_v33 = vadd.f32 %v217_v31, %v1234_v53  ;;  %v269_v19 = vmax.f32 %v235_v14, 0.0  ;;  %v191_v30 = vadd.f32 %v190_v26, %v1236_v54 }
  0xbe   :  { %v254_v41 = vmax.f32 %v169_v34, 0.0 }
  0xbf   :  { %v255_v39 = vmax.f32 %v218_v33, 0.0  ;;  %v287_v22 = vpack.c.bf16 %v269_v19, %v267_v9  ;;  %v270_v33 = vmax.f32 %v189_v29, 0.0  ;;  %v272_v34 = vmax.f32 %v191_v30, 0.0 }
  0xc2   :  { %v237_v17 = vpop.f32.mrf.mxu3 }
  0xc3   :  { %v170_v35 = vpop.f32.mrf.mxu0  ;;  %v238_v27 = vadd.f32 %v237_v17, %v1234_v53 }
  0xc4   :  { %v171_v37 = vadd.f32 %v170_v35, %v1236_v54  ;;  %v219_v38 = vpop.f32.mrf.mxu1 }
  0xc5   :  { %v220_v40 = vadd.f32 %v219_v38, %v1234_v53  ;;  %v271_v31 = vmax.f32 %v238_v27, 0.0  ;;  %v322_v38 = vld [vmem:[%s1434_s4] sm:$0x3] }
  0xc6   :  { %v256_v42 = vmax.f32 %v171_v37, 0.0  ;;  %v288_v37 = vpack.c.bf16 %v272_v34, %v270_v33 }
  0xc7   :  { %v257_v43 = vmax.f32 %v220_v40, 0.0 }
  0xc8   :  { %v280_v44 = vpack.c.bf16 %v256_v42, %v254_v41 }
  0xc9   :  { %v281_v45 = vpack.c.bf16 %v257_v43, %v255_v39  ;;  %v1273_v39 = vperm.slane %v322_v38, 1  ;;  %v716_v43 = vld [vmem:[%s1435_s5] sm:$0x3] }
  0xca   :  { %511 = vmatmul.bf16.gmra.mxu2 %v280_v44  ;;  %609 = vmatmul.bf16.gmra.mxu0 %v280_v44  ;;  %v239_v25 = vpop.f32.mrf.mxu3  ;;  %v1282_v48 = vperm.slane %v716_v43, 1 }
  0xcb   :  { %v173_v47 = vpop.f32.mrf.mxu0  ;;  %560 = vmatmul.bf16.gmra.mxu3 %v281_v45  ;;  %658 = vmatmul.bf16.gmra.mxu1 %v281_v45  ;;  %v240_v28 = vadd.f32 %v239_v25, %v1234_v53 }
  0xcc   :  { %v174_v52 = vadd.f32 %v173_v47, %v1236_v54 }
  0xcd   :  { %v273_v32 = vmax.f32 %v240_v28, 0.0 }
  0xce   :  { %v258_v58 = vmax.f32 %v174_v52, 0.0 }
  0xcf   :  { %v289_v35 = vpack.c.bf16 %v273_v32, %v271_v31 }
  0xd3   :  { %v175_v36 = vpop.f32.mrf.mxu0 }
  0xd4   :  { %v176_v55 = vadd.f32 %v175_v36, %v1236_v54  ;;  %v1276_v54 = vperm.slane %v322_v38, 0  ;;  %v1285_v36 = vperm.slane %v716_v43, 0 }
  0xd6   :  { %v260_v59 = vmax.f32 %v176_v55, 0.0 }
  0xd8   :  { %v282_v61 = vpack.c.bf16 %v260_v59, %v258_v58 }
  0xda   :  { %516 = vmatmul.bf16.gmra.mxu2 %v282_v61  ;;  %614 = vmatmul.bf16.gmra.mxu0 %v282_v61 }
  0xdb   :  { %565 = vmatmul.bf16.gmra.mxu3 %v283_v60  ;;  %663 = vmatmul.bf16.gmra.mxu1 %v283_v60 }
  0xea   :  { %521 = vmatmul.bf16.gmra.mxu2 %v284_v10  ;;  %619 = vmatmul.bf16.gmra.mxu0 %v284_v10 }
  0xeb   :  { %570 = vmatmul.bf16.gmra.mxu3 %v285_v8  ;;  %668 = vmatmul.bf16.gmra.mxu1 %v285_v8 }
  0xfa   :  { %526 = vmatmul.bf16.gmra.mxu2 %v286_v23  ;;  %624 = vmatmul.bf16.gmra.mxu0 %v286_v23 }
  0xfb   :  { %575 = vmatmul.bf16.gmra.mxu3 %v287_v22  ;;  %673 = vmatmul.bf16.gmra.mxu1 %v287_v22 }
 0x10a   :  { %531 = vmatmul.bf16.gmra.mxu2 %v288_v37 }
 0x10b   :  { %580 = vmatmul.bf16.gmra.mxu3 %v289_v35  ;;  %678 = vmatmul.bf16.gmra.mxu1 %v289_v35 }
 0x117   :  { %v595_v53 = vpop.f32.mrf.mxu0 }
 0x118   :  { %v596_v40 = vadd.f32 %v595_v53, %v1273_v39  ;;  %v644_v41 = vpop.f32.mrf.mxu1 }
 0x11a   :  { %629 = vmatmul.bf16.vlgmr.msra.gmra.mxu2 %v288_v37  ;;  %v645_v42 = vadd.f32 %v644_v41, %v596_v40 }
 0x11c   :  { %v685_v49 = vmax.f32 %v645_v42, 0.0 }
 0x11d   :  { %v497_v44 = vpop.f32.mrf.mxu2 }
 0x11e   :  { %v498_v45 = vadd.f32 %v497_v44, %v1276_v54  ;;  %v546_v46 = vpop.f32.mrf.mxu3  ;;  %v723_v57 = vmul.f32 %v1282_v48, %v685_v49 }
 0x11f   :  { %v597_v47 = vpop.f32.mrf.mxu0 }
 0x120   :  { %v547_v50 = vadd.f32 %v546_v46, %v498_v45  ;;  %v598_v52 = vadd.f32 %v597_v47, %v1273_v39  ;;  %v646_v24 = vpop.f32.mrf.mxu1 }
 0x122   :  { %v684_v51 = vmax.f32 %v547_v50, 0.0  ;;  %v647_v55 = vadd.f32 %v646_v24, %v598_v52 }
 0x124   :  { %v722_v56 = vmul.f32 %v1285_v36, %v684_v51  ;;  %v687_v63 = vmax.f32 %v647_v55, 0.0 }
 0x125   :  { %v499_v58 = vpop.f32.mrf.mxu2 }
 0x126   :  { %v500_v59 = vadd.f32 %v499_v58, %v1276_v54  ;;  %v548_v60 = vpop.f32.mrf.mxu3  ;;  %v754_v61 = vadd.f32 %v723_v57, %v722_v56  ;;  %v725_v4 = vmul.f32 %v1282_v48, %v687_v63 }
 0x127   :  { %v600_v62 = vpop.f32.mrf.mxu0 }
 0x128   :  { %v549_v0 = vadd.f32 %v548_v60, %v500_v59  ;;  %v601_v1 = vadd.f32 %v600_v62, %v1273_v39  ;;  %755 = vadd.xlane.f32.xlu0 %v754_v61  ;;  %v649_v2 = vpop.f32.mrf.mxu1 }
 0x12a   :  { %v686_v3 = vmax.f32 %v549_v0, 0.0  ;;  %v650_v6 = vadd.f32 %v649_v2, %v601_v1 }
 0x12c   :  { %v724_v5 = vmul.f32 %v1285_v36, %v686_v3  ;;  %v689_v13 = vmax.f32 %v650_v6, 0.0 }
 0x12d   :  { %v502_v7 = vpop.f32.mrf.mxu2 }
 0x12e   :  { %v503_v8 = vadd.f32 %v502_v7, %v1276_v54  ;;  %v551_v10 = vpop.f32.mrf.mxu3  ;;  %v757_v11 = vadd.f32 %v725_v4, %v724_v5  ;;  %v727_v19 = vmul.f32 %v1282_v48, %v689_v13 }
 0x12f   :  { %v602_v12 = vpop.f32.mrf.mxu0 }
 0x130   :  { %v552_v14 = vadd.f32 %v551_v10, %v503_v8  ;;  %v603_v15 = vadd.f32 %v602_v12, %v1273_v39  ;;  %758 = vadd.xlane.f32.xlu0 %v757_v11  ;;  %v651_v16 = vpop.f32.mrf.mxu1 }
 0x132   :  { %v688_v17 = vmax.f32 %v552_v14, 0.0  ;;  %v652_v9 = vadd.f32 %v651_v16, %v603_v15 }
 0x134   :  { %v726_v18 = vmul.f32 %v1285_v36, %v688_v17  ;;  %v691_v26 = vmax.f32 %v652_v9, 0.0 }
 0x135   :  { %v504_v20 = vpop.f32.mrf.mxu2 }
 0x136   :  { %v505_v21 = vadd.f32 %v504_v20, %v1276_v54  ;;  %v553_v22 = vpop.f32.mrf.mxu3  ;;  %v760_v23 = vadd.f32 %v727_v19, %v726_v18  ;;  %v729_v31 = vmul.f32 %v1282_v48, %v691_v26 }
 0x137   :  { %v605_v25 = vpop.f32.mrf.mxu0 }
 0x138   :  { %v554_v27 = vadd.f32 %v553_v22, %v505_v21  ;;  %v606_v28 = vadd.f32 %v605_v25, %v1273_v39  ;;  %761 = vadd.xlane.f32.xlu1 %v760_v23  ;;  %v654_v29 = vpop.f32.mrf.mxu1 }
 0x13a   :  { %v690_v30 = vmax.f32 %v554_v27, 0.0  ;;  %v655_v33 = vadd.f32 %v654_v29, %v606_v28 }
 0x13c   :  { %v728_v32 = vmul.f32 %v1285_v36, %v690_v30  ;;  %v693_v40 = vmax.f32 %v655_v33, 0.0 }
 0x13d   :  { %v507_v34 = vpop.f32.mrf.mxu2 }
 0x13e   :  { %v508_v35 = vadd.f32 %v507_v34, %v1276_v54  ;;  %v556_v37 = vpop.f32.mrf.mxu3  ;;  %v763_v38 = vadd.f32 %v729_v31, %v728_v32  ;;  %v731_v47 = vmul.f32 %v1282_v48, %v693_v40 }
 0x13f   :  { %v607_v53 = vpop.f32.mrf.mxu0 }
 0x140   :  { %v557_v41 = vadd.f32 %v556_v37, %v508_v35  ;;  %v608_v42 = vadd.f32 %v607_v53, %v1273_v39  ;;  %764 = vadd.xlane.f32.xlu1 %v763_v38  ;;  %v656_v43 = vpop.f32.mrf.mxu1 }
 0x142   :  { %v692_v44 = vmax.f32 %v557_v41, 0.0  ;;  %v657_v45 = vadd.f32 %v656_v43, %v608_v42 }
 0x144   :  { %v730_v46 = vmul.f32 %v1285_v36, %v692_v44  ;;  %v695_v55 = vmax.f32 %v657_v45, 0.0 }
 0x145   :  { %v509_v49 = vpop.f32.mrf.mxu2 }
 0x146   :  { %v510_v50 = vadd.f32 %v509_v49, %v1276_v54  ;;  %v558_v52 = vpop.f32.mrf.mxu3  ;;  %v766_v24 = vadd.f32 %v731_v47, %v730_v46  ;;  %v733_v60 = vmul.f32 %v1282_v48, %v695_v55 }
 0x147   :  { %v610_v51 = vpop.f32.mrf.mxu0 }
 0x148   :  { %v559_v56 = vadd.f32 %v558_v52, %v510_v50  ;;  %v611_v57 = vadd.f32 %v610_v51, %v1273_v39  ;;  %767 = vadd.xlane.f32.xlu2 %v766_v24  ;;  %v659_v58 = vpop.f32.mrf.mxu1 }
 0x14a   :  { %v694_v59 = vmax.f32 %v559_v56, 0.0  ;;  %v660_v62 = vadd.f32 %v659_v58, %v611_v57 }
 0x14c   :  { %v732_v61 = vmul.f32 %v1285_v36, %v694_v59  ;;  %v697_v4 = vmax.f32 %v660_v62, 0.0 }
 0x14d   :  { %v512_v63 = vpop.f32.mrf.mxu2 }
 0x14e   :  { %v513_v0 = vadd.f32 %v512_v63, %v1276_v54  ;;  %v561_v1 = vpop.f32.mrf.mxu3  ;;  %v769_v2 = vadd.f32 %v733_v60, %v732_v61  ;;  %v735_v10 = vmul.f32 %v1282_v48, %v697_v4 }
 0x14f   :  { %v612_v3 = vpop.f32.mrf.mxu0 }
 0x150   :  { %v562_v5 = vadd.f32 %v561_v1, %v513_v0  ;;  %v613_v6 = vadd.f32 %v612_v3, %v1273_v39  ;;  %770 = vadd.xlane.f32.xlu2 %v769_v2  ;;  %v661_v7 = vpop.f32.mrf.mxu1 }
 0x152   :  { %v696_v8 = vmax.f32 %v562_v5, 0.0  ;;  %v662_v12 = vadd.f32 %v661_v7, %v613_v6 }
 0x154   :  { %v734_v11 = vmul.f32 %v1285_v36, %v696_v8  ;;  %v699_v9 = vmax.f32 %v662_v12, 0.0 }
 0x155   :  { %v514_v13 = vpop.f32.mrf.mxu2 }
 0x156   :  { %v515_v14 = vadd.f32 %v514_v13, %v1276_v54  ;;  %v563_v15 = vpop.f32.mrf.mxu3  ;;  %v772_v16 = vadd.f32 %v735_v10, %v734_v11  ;;  %v737_v22 = vmul.f32 %v1282_v48, %v699_v9 }
 0x157   :  { %v615_v17 = vpop.f32.mrf.mxu0 }
 0x158   :  { %v564_v18 = vadd.f32 %v563_v15, %v515_v14  ;;  %v616_v19 = vadd.f32 %v615_v17, %v1273_v39  ;;  %773 = vadd.xlane.f32.xlu0 %v772_v16  ;;  %v664_v20 = vpop.f32.mrf.mxu1 }
 0x15a   :  { %v698_v21 = vmax.f32 %v564_v18, 0.0  ;;  %v665_v25 = vadd.f32 %v664_v20, %v616_v19 }
 0x15c   :  { %v736_v23 = vmul.f32 %v1285_v36, %v698_v21  ;;  %v701_v31 = vmax.f32 %v665_v25, 0.0 }
 0x15d   :  { %v517_v26 = vpop.f32.mrf.mxu2 }
 0x15e   :  { %v518_v27 = vadd.f32 %v517_v26, %v1276_v54  ;;  %v566_v28 = vpop.f32.mrf.mxu3  ;;  %v775_v29 = vadd.f32 %v737_v22, %v736_v23  ;;  %v739_v37 = vmul.f32 %v1282_v48, %v701_v31 }
 0x15f   :  { %v617_v30 = vpop.f32.mrf.mxu0 }
 0x160   :  { %v567_v32 = vadd.f32 %v566_v28, %v518_v27  ;;  %v618_v33 = vadd.f32 %v617_v30, %v1273_v39  ;;  %776 = vadd.xlane.f32.xlu1 %v775_v29  ;;  %v666_v34 = vpop.f32.mrf.mxu1 }
 0x162   :  { %v700_v35 = vmax.f32 %v567_v32, 0.0  ;;  %v667_v53 = vadd.f32 %v666_v34, %v618_v33 }
 0x164   :  { %v738_v38 = vmul.f32 %v1285_v36, %v700_v35  ;;  %v703_v45 = vmax.f32 %v667_v53, 0.0 }
 0x165   :  { %v519_v40 = vpop.f32.mrf.mxu2 }
 0x166   :  { %v520_v41 = vadd.f32 %v519_v40, %v1276_v54  ;;  %v568_v42 = vpop.f32.mrf.mxu3  ;;  %v778_v43 = vadd.f32 %v739_v37, %v738_v38  ;;  %v741_v52 = vmul.f32 %v1282_v48, %v703_v45 }
 0x167   :  { %v620_v44 = vpop.f32.mrf.mxu0 }
 0x168   :  { %v569_v46 = vadd.f32 %v568_v42, %v520_v41  ;;  %v621_v47 = vadd.f32 %v620_v44, %v1273_v39  ;;  %779 = vadd.xlane.f32.xlu2 %v778_v43  ;;  %v669_v49 = vpop.f32.mrf.mxu1 }
 0x16a   :  { %v702_v50 = vmax.f32 %v569_v46, 0.0  ;;  %v670_v51 = vadd.f32 %v669_v49, %v621_v47  ;;  %v1341_v46 = vld [vmem:[#allocation2] ss:$0 sm:$0xff] }
 0x16c   :  { %v740_v24 = vmul.f32 %v1285_v36, %v702_v50  ;;  %v705_v60 = vmax.f32 %v670_v51, 0.0 }
 0x16d   :  { %v522_v55 = vpop.f32.mrf.mxu2 }
 0x16e   :  { %v523_v56 = vadd.f32 %v522_v55, %v1276_v54  ;;  %v571_v57 = vpop.f32.mrf.mxu3  ;;  %v781_v58 = vadd.f32 %v741_v52, %v740_v24  ;;  %v743_v1 = vmul.f32 %v1282_v48, %v705_v60 }
 0x16f   :  { %v622_v59 = vpop.f32.mrf.mxu0 }
 0x170   :  { %v572_v61 = vadd.f32 %v571_v57, %v523_v56  ;;  %v623_v62 = vadd.f32 %v622_v59, %v1273_v39  ;;  %782 = vadd.xlane.f32.xlu0 %v781_v58  ;;  %v671_v63 = vpop.f32.mrf.mxu1 }
 0x172   :  { %v704_v0 = vmax.f32 %v572_v61, 0.0  ;;  %v672_v3 = vadd.f32 %v671_v63, %v623_v62 }
 0x174   :  { %v742_v2 = vmul.f32 %v1285_v36, %v704_v0  ;;  %v707_v10 = vmax.f32 %v672_v3, 0.0 }
 0x175   :  { %v524_v4 = vpop.f32.mrf.mxu2 }
 0x176   :  { %v525_v5 = vadd.f32 %v524_v4, %v1276_v54  ;;  %v573_v6 = vpop.f32.mrf.mxu3  ;;  %v784_v7 = vadd.f32 %v743_v1, %v742_v2  ;;  %v745_v15 = vmul.f32 %v1282_v48, %v707_v10 }
 0x177   :  { %v625_v8 = vpop.f32.mrf.mxu0 }
 0x178   :  { %v574_v11 = vadd.f32 %v573_v6, %v525_v5  ;;  %v626_v12 = vadd.f32 %v625_v8, %v1273_v39  ;;  %785 = vadd.xlane.f32.xlu1 %v784_v7  ;;  %v674_v13 = vpop.f32.mrf.mxu1 }
 0x17a   :  { %v706_v14 = vmax.f32 %v574_v11, 0.0  ;;  %v675_v17 = vadd.f32 %v674_v13, %v626_v12 }
 0x17c   :  { %v744_v16 = vmul.f32 %v1285_v36, %v706_v14  ;;  %v709_v22 = vmax.f32 %v675_v17, 0.0 }
 0x17d   :  { %v527_v9 = vpop.f32.mrf.mxu2 }
 0x17e   :  { %v528_v18 = vadd.f32 %v527_v9, %v1276_v54  ;;  %v576_v19 = vpop.f32.mrf.mxu3  ;;  %v787_v20 = vadd.f32 %v745_v15, %v744_v16  ;;  %v747_v28 = vmul.f32 %v1282_v48, %v709_v22 }
 0x17f   :  { %v627_v21 = vpop.f32.mrf.mxu0 }
 0x180   :  { %v577_v23 = vadd.f32 %v576_v19, %v528_v18  ;;  %v628_v25 = vadd.f32 %v627_v21, %v1273_v39  ;;  %788 = vadd.xlane.f32.xlu2 %v787_v20  ;;  %v676_v26 = vpop.f32.mrf.mxu1 }
 0x182   :  { %v708_v27 = vmax.f32 %v577_v23, 0.0  ;;  %v677_v30 = vadd.f32 %v676_v26, %v628_v25 }
 0x184   :  { %v746_v29 = vmul.f32 %v1285_v36, %v708_v27  ;;  %v711_v35 = vmax.f32 %v677_v30, 0.0 }
 0x185   :  { %v529_v31 = vpop.f32.mrf.mxu2 }
 0x186   :  { %v530_v32 = vadd.f32 %v529_v31, %v1276_v54  ;;  %v578_v33 = vpop.f32.mrf.mxu3  ;;  %v790_v34 = vadd.f32 %v747_v28, %v746_v29  ;;  %v749_v53 = vmul.f32 %v1282_v48, %v711_v35 }
 0x188   :  { %v579_v37 = vadd.f32 %v578_v33, %v530_v32  ;;  %791 = vadd.xlane.f32.xlu0 %v790_v34  ;;  %v679_v52 = vpop.f32.mrf.mxu1 }
 0x18a   :  { %v710_v38 = vmax.f32 %v579_v37, 0.0 }
 0x18c   :  { %v748_v40 = vmul.f32 %v1285_v36, %v710_v38 }
 0x18d   :  { %v532_v41 = vpop.f32.mrf.mxu2 }
 0x18e   :  { %v793_v42 = vadd.f32 %v749_v53, %v748_v40  ;;  %v581_v44 = vpop.f32.mrf.mxu3  ;;  %v533_v45 = vadd.f32 %v532_v41, %v1276_v54 }
 0x190   :  { %794 = vadd.xlane.f32.xlu1 %v793_v42  ;;  %v582_v49 = vadd.f32 %v581_v44, %v533_v45  ;;  %v681_v3 = vpop.f32.mrf.mxu1 }
 0x192   :  { %v712_v55 = vmax.f32 %v582_v49, 0.0 }
 0x194   :  { %v750_v61 = vmul.f32 %v1285_v36, %v712_v55 }
 0x195   :  { %v534_v43 = vpop.f32.mrf.mxu2 }
 0x196   :  { %v535_v56 = vadd.f32 %v534_v43, %v1276_v54  ;;  %v583_v58 = vpop.f32.mrf.mxu3 }
 0x198   :  { %v584_v62 = vadd.f32 %v583_v58, %v535_v56 }
 0x19a   :  { %v714_v4 = vmax.f32 %v584_v62, 0.0 }
 0x19b   :  { %v756_v47 = vpop.xlane.xlu0 %755 }
 0x19c   :  { %v806_v50 = vadd.f32 %v1341_v46, %v756_v47  ;;  %v752_v8 = vmul.f32 %v1285_v36, %v714_v4 }
 0x19d   :  { %v630_v24 = vpop.f32.mrf.mxu2 }
 0x19e   :  { %823 = vst.msk [vmem:[%s1437_s7] sm:$0xff] %vm822_vm1, %v806_v50  ;;  %v631_v51 = vadd.f32 %v630_v24, %v1273_v39 }
 0x1a0   :  { %v680_v57 = vadd.f32 %v679_v52, %v631_v51 }
 0x1a2   :  { %v713_v59 = vmax.f32 %v680_v57, 0.0 }
 0x1a3   :  { %v759_v60 = vpop.xlane.xlu0 %758 }
 0x1a4   :  { %v807_v63 = vadd.f32 %v1341_v46, %v759_v60  ;;  %v751_v0 = vmul.f32 %v1282_v48, %v713_v59 }
 0x1a5   :  { %v632_v1 = vpop.f32.mrf.mxu2 }
 0x1a6   :  { %824 = vst.msk [vmem:[%s1437_s7 + $0x8] sm:$0xff] %vm822_vm1, %v807_v63  ;;  %v633_v2 = vadd.f32 %v632_v1, %v1273_v39  ;;  %v796_v54 = vadd.f32 %v751_v0, %v750_v61 }
 0x1a8   :  { %v682_v5 = vadd.f32 %v681_v3, %v633_v2  ;;  %797 = vadd.xlane.f32.xlu2 %v796_v54 }
 0x1aa   :  { %v715_v6 = vmax.f32 %v682_v5, 0.0 }
 0x1ab   :  { %v762_v7 = vpop.xlane.xlu1 %761 }
 0x1ac   :  { %v808_v10 = vadd.f32 %v1341_v46, %v762_v7  ;;  %v753_v11 = vmul.f32 %v1282_v48, %v715_v6 }
 0x1ae   :  { %825 = vst.msk [vmem:[%s1437_s7 + $0x10] sm:$0xff] %vm822_vm1, %v808_v10  ;;  %v799_v12 = vadd.f32 %v753_v11, %v752_v8 }
 0x1b0   :  { %800 = vadd.xlane.f32.xlu0 %v799_v12 }
 0x1b3   :  { %v765_v39 = vpop.xlane.xlu1 %764 }
 0x1b4   :  { %v809_v13 = vadd.f32 %v1341_v46, %v765_v39 }
 0x1b6   :  { %826 = vst.msk [vmem:[%s1437_s7 + $0x18] sm:$0xff] %vm822_vm1, %v809_v13 }
 0x1bb   :  { %v768_v36 = vpop.xlane.xlu2 %767 }
 0x1bc   :  { %v810_v14 = vadd.f32 %v1341_v46, %v768_v36 }
 0x1be   :  { %827 = vst.msk [vmem:[%s1437_s7 + $0x20] sm:$0xff] %vm822_vm1, %v810_v14 }
 0x1c3   :  { %v771_v48 = vpop.xlane.xlu2 %770 }
 0x1c4   :  { %v811_v15 = vadd.f32 %v1341_v46, %v771_v48 }
 0x1c6   :  { %828 = vst.msk [vmem:[%s1437_s7 + $0x28] sm:$0xff] %vm822_vm1, %v811_v15 }
 0x1cb   :  { %v774_v16 = vpop.xlane.xlu0 %773 }
 0x1cc   :  { %v812_v17 = vadd.f32 %v1341_v46, %v774_v16 }
 0x1ce   :  { %829 = vst.msk [vmem:[%s1437_s7 + $0x30] sm:$0xff] %vm822_vm1, %v812_v17 }
 0x1d3   :  { %v777_v9 = vpop.xlane.xlu1 %776 }
 0x1d4   :  { %v813_v18 = vadd.f32 %v1341_v46, %v777_v9 }
 0x1d6   :  { %830 = vst.msk [vmem:[%s1437_s7 + $0x38] sm:$0xff] %vm822_vm1, %v813_v18 }
 0x1db   :  { %v780_v19 = vpop.xlane.xlu2 %779 }
 0x1dc   :  { %v814_v20 = vadd.f32 %v1341_v46, %v780_v19 }
 0x1de   :  { %831 = vst.msk [vmem:[%s1437_s7 + $0x40] sm:$0xff] %vm822_vm1, %v814_v20 }
 0x1e3   :  { %v783_v21 = vpop.xlane.xlu0 %782 }
 0x1e4   :  { %v815_v22 = vadd.f32 %v1341_v46, %v783_v21 }
 0x1e6   :  { %832 = vst.msk [vmem:[%s1437_s7 + $0x48] sm:$0xff] %vm822_vm1, %v815_v22 }
 0x1eb   :  { %v786_v23 = vpop.xlane.xlu1 %785 }
 0x1ec   :  { %v816_v25 = vadd.f32 %v1341_v46, %v786_v23 }
 0x1ee   :  { %833 = vst.msk [vmem:[%s1437_s7 + $0x50] sm:$0xff] %vm822_vm1, %v816_v25 }
 0x1f3   :  { %v789_v26 = vpop.xlane.xlu2 %788 }
 0x1f4   :  { %v817_v27 = vadd.f32 %v1341_v46, %v789_v26 }
 0x1f6   :  { %834 = vst.msk [vmem:[%s1437_s7 + $0x58] sm:$0xff] %vm822_vm1, %v817_v27 }
 0x1fb   :  { %v792_v28 = vpop.xlane.xlu0 %791 }
 0x1fc   :  { %v818_v29 = vadd.f32 %v1341_v46, %v792_v28 }
 0x1fe   :  { %835 = vst.msk [vmem:[%s1437_s7 + $0x60] sm:$0xff] %vm822_vm1, %v818_v29 }
 0x203   :  { %v795_v30 = vpop.xlane.xlu1 %794 }
 0x204   :  { %v819_v31 = vadd.f32 %v1341_v46, %v795_v30 }
 0x206   :  { %836 = vst.msk [vmem:[%s1437_s7 + $0x68] sm:$0xff] %vm822_vm1, %v819_v31 }
 0x21b   :  { %v798_v32 = vpop.xlane.xlu2 %797 }
 0x21c   :  { %v820_v33 = vadd.f32 %v1341_v46, %v798_v32 }
 0x21e   :  { %837 = vst.msk [vmem:[%s1437_s7 + $0x70] sm:$0xff] %vm822_vm1, %v820_v33 }
 0x223   :  { %v801_v34 = vpop.xlane.xlu0 %800 }
 0x224   :  { %v821_v35 = vadd.f32 %v1341_v46, %v801_v34 }
 0x226   :  { %838 = vst.msk [vmem:[%s1437_s7 + $0x78] sm:$0xff] %vm822_vm1, %v821_v35 }
 0x227   :  { %843 = vsyncpa [#allocation4], 1 }

</bundles_post_ra>
